<compile_context>
chip_gen: v6e
topology: v6e:2x2x1
jax: 0.10.0
libtpu: 0.0.40
codegen_flags: <defaults>
</compile_context>

<pallas_src>
import math

import jax
import jax.numpy as jnp
from jax.experimental import pallas as pl
from jax.experimental.pallas import tpu as pltpu


def _round_up(x, m):
    return (x + m - 1) // m * m


def _make_iou_kernel(tr, nt, nr, rows_last, need_row_mask, may_overrun):
    """Per-(split, sample) partial-sum kernel.

    p_ref / t_ref : (TR, 128) row-tile of one sample (native HBM dtype).
    iand_ref      : (8, 128) f32 resident block accumulating sum(t*p) slabs.
    tot_ref       : (8, 128) f32 resident block accumulating sum(t)+sum(p) slabs.
    """

    def _fold(x):
        # (TR,128) -> (8,128) by summing 8-row slabs: pure vreg adds on the
        # VPU; the final cross-lane reduce happens once in the wrapper.
        if tr == 8:
            return x
        return jnp.sum(x.reshape(tr // 8, 8, 128), axis=0)

    def kernel(p_ref, t_ref, iand_ref, tot_ref):
        s = pl.program_id(0)   # reduction-axis split (megacore)
        r = pl.program_id(2)   # row-tile step within this split
        t_idx = s * nr + r     # global row-tile index for this sample

        @pl.when(r == 0)
        def _init():
            iand_ref[...] = jnp.zeros_like(iand_ref)
            tot_ref[...] = jnp.zeros_like(tot_ref)

        def accumulate(p, t):
            iand_ref[...] += _fold(t * p)
            # sum(t) + sum(p) == sum(t + p): one fused VPU add, one fold.
            tot_ref[...] += _fold(t + p)

        if need_row_mask:
            # Interior tiles: no masking cost.
            @pl.when(t_idx < nt - 1)
            def _interior():
                accumulate(p_ref[...].astype(jnp.float32),
                           t_ref[...].astype(jnp.float32))

            # Last (partial) tile only: zero out-of-bounds rows before summing.
            @pl.when(t_idx == nt - 1)
            def _tail():
                row = jax.lax.broadcasted_iota(jnp.int32, (tr, 128), 0)
                valid = row < rows_last
                p = jnp.where(valid, p_ref[...].astype(jnp.float32), 0.0)
                t = jnp.where(valid, t_ref[...].astype(jnp.float32), 0.0)
                accumulate(p, t)
        elif may_overrun:
            # Uneven 2-way split: the last split may have one empty step.
            @pl.when(t_idx < nt)
            def _body():
                accumulate(p_ref[...].astype(jnp.float32),
                           t_ref[...].astype(jnp.float32))
        else:
            accumulate(p_ref[...].astype(jnp.float32),
                       t_ref[...].astype(jnp.float32))

    return kernel


def iou_loss(pred, target, *, target_block_bytes=2 << 20):
    """Pallas TPU implementation of IOULoss.forward."""
    assert pred.shape == target.shape, (pred.shape, target.shape)
    b = pred.shape[0]
    n = math.prod(pred.shape[1:])

    # Free reshape only; keep floating dtypes native in HBM (cast per tile in
    # the kernel). Integer / bool inputs are cast once here for simplicity.
    p2 = pred.reshape(b, n)
    t2 = target.reshape(b, n)
    if not jnp.issubdtype(p2.dtype, jnp.floating):
        p2 = p2.astype(jnp.float32)
    if not jnp.issubdtype(t2.dtype, jnp.floating):
        t2 = t2.astype(jnp.float32)

    # View each sample as (rows, 128) so every tile is (8m, 128): full-sublane
    # vregs regardless of batch size. Zero-pad the feature axis only when it
    # is not already a multiple of 128 (zeros are exactly neutral for the
    # sums); common image shapes (C*H*W % 128 == 0) take the copy-free path.
    n_pad = max(_round_up(n, 128), 8 * 128)
    if n_pad != n:
        p2 = jnp.pad(p2, ((0, 0), (0, n_pad - n)))
        t2 = jnp.pad(t2, ((0, 0), (0, n_pad - n)))
    rows = n_pad // 128
    p3 = p2.reshape(b, rows, 128)
    t3 = t2.reshape(b, rows, 128)

    # Row-tile size: ~target_block_bytes per input block, multiple of 8 rows
    # (aligned to the packed-sublane granule for narrow dtypes when possible).
    itemsize = max(p3.dtype.itemsize, t3.dtype.itemsize)
    tr = max(8, min((target_block_bytes // (128 * itemsize)) // 8 * 8,
                    (rows // 8) * 8))
    granule = 8 if itemsize >= 4 else (16 if itemsize == 2 else 32)
    if granule > 8 and tr >= granule:
        tr = (tr // granule) * granule

    nt = pl.cdiv(rows, tr)           # row tiles per sample
    ns = 2 if nt >= 2 else 1         # parallel split of the reduction axis
    nr = pl.cdiv(nt, ns)             # row tiles per split
    rows_last = rows - (nt - 1) * tr
    need_row_mask = rows_last != tr
    may_overrun = ns * nr != nt

    kernel = _make_iou_kernel(tr, nt, nr, rows_last, need_row_mask, may_overrun)

    def in_map(s, i, r):
        # Clamp so an (optional) empty trailing split step never DMAs OOB.
        return (i, jnp.minimum(s * nr + r, nt - 1), 0)

    def out_map(s, i, r):
        return (s, i, 0, 0)

    part_shape = jax.ShapeDtypeStruct((ns, b, 8, 128), jnp.float32)
    iand_part, tot_part = pl.pallas_call(
        kernel,
        out_shape=(part_shape, part_shape),
        grid_spec=pltpu.PrefetchScalarGridSpec(
            num_scalar_prefetch=0,
            grid=(ns, b, nr),
            in_specs=[
                pl.BlockSpec((None, tr, 128), in_map),
                pl.BlockSpec((None, tr, 128), in_map),
            ],
            out_specs=(
                pl.BlockSpec((None, None, 8, 128), out_map),
                pl.BlockSpec((None, None, 8, 128), out_map),
            ),
        ),
        compiler_params=pltpu.CompilerParams(
            dimension_semantics=("parallel", "parallel", "arbitrary"),
            vmem_limit_bytes=48 * 1024 * 1024,
        ),
    )(p3, t3)

    # Tiny epilogue: collapse splits/sublanes/lanes, then 1 - I/U and mean.
    iand = jnp.sum(iand_part, axis=(0, 2, 3))
    tot = jnp.sum(tot_part, axis=(0, 2, 3))
    union = tot - iand
    # Matches reference semantics (including NaN/Inf if a sample is all-zero).
    return jnp.mean(1.0 - iand / union)


def iou_loss_ref(pred, target):
    """Pure-JAX reference mirroring the PyTorch loop."""
    b = pred.shape[0]
    iou = 0.0
    for i in range(b):
        p = pred[i].astype(jnp.float32)
        t = target[i].astype(jnp.float32)
        iand = jnp.sum(t * p)
        ior = jnp.sum(t) + jnp.sum(p) - iand
        iou = iou + (1.0 - iand / ior)
    return iou / b


if __name__ == "__main__":
    key = jax.random.PRNGKey(0)
    kp, kt, kp2, kt2 = jax.random.split(key, 4)

    # Primary test: saliency-style inputs (B, C, H, W) = (2, 4, 16, 16).
    B, C, H, W = 2, 4, 16, 16
    pred = jax.nn.sigmoid(jax.random.normal(kp, (B, C, H, W), dtype=jnp.float32))
    target = (jax.random.uniform(kt, (B, C, H, W)) > 0.5).astype(jnp.float32)

    out = jax.block_until_ready(iou_loss(pred, target))
    ref = jax.block_until_ready(iou_loss_ref(pred, target))
    assert jnp.allclose(out, ref, rtol=1e-5, atol=1e-6), (out, ref)

    # Secondary test: exercises the 2-way reduction split, multi-tile
    # accumulation and the last-tile row mask (rows=10, tr=8 -> 2 tiles,
    # second tile has only 2 valid rows).
    B2, C2, H2, W2 = 2, 4, 16, 20
    pred2 = jax.nn.sigmoid(jax.random.normal(kp2, (B2, C2, H2, W2), dtype=jnp.float32))
    target2 = (jax.random.uniform(kt2, (B2, C2, H2, W2)) > 0.5).astype(jnp.float32)

    out2 = jax.block_until_ready(iou_loss(pred2, target2, target_block_bytes=4096))
    ref2 = jax.block_until_ready(iou_loss_ref(pred2, target2))
    assert jnp.allclose(out2, ref2, rtol=1e-5, atol=1e-6), (out2, ref2)

    print("KERNEL_OK")
</pallas_src>

<mosaic_0001>
module attributes {stable_mosaic.version = 11 : i64} {
  func.func @kernel(%arg0: i32, %arg1: i32, %arg2: i32, %arg3: memref<1x8x128xf32, #tpu.memory_space<vmem>>, %arg4: memref<1x8x128xf32, #tpu.memory_space<vmem>>, %arg5: memref<1x1x8x128xf32, #tpu.memory_space<vmem>>, %arg6: memref<1x1x8x128xf32, #tpu.memory_space<vmem>>) attributes {dimension_semantics = [#tpu.dimension_semantics<parallel>, #tpu.dimension_semantics<parallel>, #tpu.dimension_semantics<arbitrary>], iteration_bounds = array<i64: 1, 2, 1>, scalar_prefetch = 0 : i64, scratch_operands = 0 : i64, tpu.core_type = #tpu.core_type<tc>, window_params = [{transform_indices = @transform_0, window_bounds = array<i64: 1, 8, 128>}, {transform_indices = @transform_1, window_bounds = array<i64: 1, 8, 128>}, {transform_indices = @transform_2, window_bounds = array<i64: 1, 1, 8, 128>}, {transform_indices = @transform_3, window_bounds = array<i64: 1, 1, 8, 128>}]} {
    %c0_i32 = arith.constant 0 : i32
    %0 = arith.cmpi eq, %arg2, %c0_i32 : i32
    %1 = arith.extui %0 : i1 to i32
    %c0_i32_0 = arith.constant 0 : i32
    %2 = arith.cmpi ne, %1, %c0_i32_0 : i32
    scf.if %2 {
      %cst = arith.constant 0.000000e+00 : f32
      %21 = vector.broadcast %cst : f32 to vector<8x128xf32>
      %c0_22 = arith.constant 0 : index
      %c0_23 = arith.constant 0 : index
      %c0_24 = arith.constant 0 : index
      %c0_25 = arith.constant 0 : index
      %22 = vector.load %arg5[%c0_22, %c0_23, %c0_24, %c0_25] : memref<1x1x8x128xf32, #tpu.memory_space<vmem>>, vector<1x1x8x128xf32>
      %23 = vector.shape_cast %22 : vector<1x1x8x128xf32> to vector<8x128xf32>
      %24 = vector.shape_cast %21 : vector<8x128xf32> to vector<1x1x8x128xf32>
      tpu.vector_store %arg5[%c0_22, %c0_23, %c0_24, %c0_25], %24 {strides = array<i32>} : memref<1x1x8x128xf32, #tpu.memory_space<vmem>>, vector<1x1x8x128xf32>,
      %cst_26 = arith.constant 0.000000e+00 : f32
      %25 = vector.broadcast %cst_26 : f32 to vector<8x128xf32>
      %c0_27 = arith.constant 0 : index
      %c0_28 = arith.constant 0 : index
      %c0_29 = arith.constant 0 : index
      %c0_30 = arith.constant 0 : index
      %26 = vector.load %arg6[%c0_27, %c0_28, %c0_29, %c0_30] : memref<1x1x8x128xf32, #tpu.memory_space<vmem>>, vector<1x1x8x128xf32>
      %27 = vector.shape_cast %26 : vector<1x1x8x128xf32> to vector<8x128xf32>
      %28 = vector.shape_cast %25 : vector<8x128xf32> to vector<1x1x8x128xf32>
      tpu.vector_store %arg6[%c0_27, %c0_28, %c0_29, %c0_30], %28 {strides = array<i32>} : memref<1x1x8x128xf32, #tpu.memory_space<vmem>>, vector<1x1x8x128xf32>,
    } else {
    }
    %c0 = arith.constant 0 : index
    %c0_1 = arith.constant 0 : index
    %c0_2 = arith.constant 0 : index
    %3 = vector.load %arg3[%c0, %c0_1, %c0_2] : memref<1x8x128xf32, #tpu.memory_space<vmem>>, vector<1x8x128xf32>
    %4 = vector.shape_cast %3 : vector<1x8x128xf32> to vector<8x128xf32>
    %c0_3 = arith.constant 0 : index
    %c0_4 = arith.constant 0 : index
    %c0_5 = arith.constant 0 : index
    %5 = vector.load %arg4[%c0_3, %c0_4, %c0_5] : memref<1x8x128xf32, #tpu.memory_space<vmem>>, vector<1x8x128xf32>
    %6 = vector.shape_cast %5 : vector<1x8x128xf32> to vector<8x128xf32>
    %c0_6 = arith.constant 0 : index
    %c0_7 = arith.constant 0 : index
    %c0_8 = arith.constant 0 : index
    %c0_9 = arith.constant 0 : index
    %7 = vector.load %arg5[%c0_6, %c0_7, %c0_8, %c0_9] : memref<1x1x8x128xf32, #tpu.memory_space<vmem>>, vector<1x1x8x128xf32>
    %8 = vector.shape_cast %7 : vector<1x1x8x128xf32> to vector<8x128xf32>
    %9 = arith.mulf %6, %4 : vector<8x128xf32>
    %10 = arith.addf %8, %9 : vector<8x128xf32>
    %c0_10 = arith.constant 0 : index
    %c0_11 = arith.constant 0 : index
    %c0_12 = arith.constant 0 : index
    %c0_13 = arith.constant 0 : index
    %11 = vector.load %arg5[%c0_10, %c0_11, %c0_12, %c0_13] : memref<1x1x8x128xf32, #tpu.memory_space<vmem>>, vector<1x1x8x128xf32>
    %12 = vector.shape_cast %11 : vector<1x1x8x128xf32> to vector<8x128xf32>
    %13 = vector.shape_cast %10 : vector<8x128xf32> to vector<1x1x8x128xf32>
    tpu.vector_store %arg5[%c0_10, %c0_11, %c0_12, %c0_13], %13 {strides = array<i32>} : memref<1x1x8x128xf32, #tpu.memory_space<vmem>>, vector<1x1x8x128xf32>,
    %c0_14 = arith.constant 0 : index
    %c0_15 = arith.constant 0 : index
    %c0_16 = arith.constant 0 : index
    %c0_17 = arith.constant 0 : index
    %14 = vector.load %arg6[%c0_14, %c0_15, %c0_16, %c0_17] : memref<1x1x8x128xf32, #tpu.memory_space<vmem>>, vector<1x1x8x128xf32>
    %15 = vector.shape_cast %14 : vector<1x1x8x128xf32> to vector<8x128xf32>
    %16 = arith.addf %6, %4 : vector<8x128xf32>
    %17 = arith.addf %15, %16 : vector<8x128xf32>
    %c0_18 = arith.constant 0 : index
    %c0_19 = arith.constant 0 : index
    %c0_20 = arith.constant 0 : index
    %c0_21 = arith.constant 0 : index
    %18 = vector.load %arg6[%c0_18, %c0_19, %c0_20, %c0_21] : memref<1x1x8x128xf32, #tpu.memory_space<vmem>>, vector<1x1x8x128xf32>
    %19 = vector.shape_cast %18 : vector<1x1x8x128xf32> to vector<8x128xf32>
    %20 = vector.shape_cast %17 : vector<8x128xf32> to vector<1x1x8x128xf32>
    tpu.vector_store %arg6[%c0_18, %c0_19, %c0_20, %c0_21], %20 {strides = array<i32>} : memref<1x1x8x128xf32, #tpu.memory_space<vmem>>, vector<1x1x8x128xf32>,
    return
  }
  func.func @transform_0(%arg0: i32, %arg1: i32, %arg2: i32) -> (i32, i32, i32) {
    %c1_i32 = arith.constant 1 : i32
    %0 = arith.muli %arg0, %c1_i32 : i32
    %1 = arith.addi %0, %arg2 : i32
    %c0_i32 = arith.constant 0 : i32
    %2 = arith.minsi %1, %c0_i32 : i32
    %c0_i32_0 = arith.constant 0 : i32
    %c0_i32_1 = arith.constant 0 : i32
    return %arg1, %2, %c0_i32_0 : i32, i32, i32
  }
  func.func @transform_1(%arg0: i32, %arg1: i32, %arg2: i32) -> (i32, i32, i32) {
    %c1_i32 = arith.constant 1 : i32
    %0 = arith.muli %arg0, %c1_i32 : i32
    %1 = arith.addi %0, %arg2 : i32
    %c0_i32 = arith.constant 0 : i32
    %2 = arith.minsi %1, %c0_i32 : i32
    %c0_i32_0 = arith.constant 0 : i32
    %c0_i32_1 = arith.constant 0 : i32
    return %arg1, %2, %c0_i32_0 : i32, i32, i32
  }
  func.func @transform_2(%arg0: i32, %arg1: i32, %arg2: i32) -> (i32, i32, i32, i32) {
    %c0_i32 = arith.constant 0 : i32
    %c0_i32_0 = arith.constant 0 : i32
    %c0_i32_1 = arith.constant 0 : i32
    return %arg0, %arg1, %c0_i32, %c0_i32_0 : i32, i32, i32, i32
  }
  func.func @transform_3(%arg0: i32, %arg1: i32, %arg2: i32) -> (i32, i32, i32, i32) {
    %c0_i32 = arith.constant 0 : i32
    %c0_i32_0 = arith.constant 0 : i32
    %c0_i32_1 = arith.constant 0 : i32
    return %arg0, %arg1, %c0_i32, %c0_i32_0 : i32, i32, i32, i32
  }
}

</mosaic_0001>

<bundles_post_ra>
// kernel: tpu_custom_call.1
= control target key start
LH: loop header
LB: loop body
LE: loop exit
PB: predicated region body
PF: predicated region fallthrough
CT: control target
= control target key end

     0   :  { %9 = vsyncpa [#allocation3], 0  ;;  %s970_s0 = inlined_call_operand.hbm [shape: f32[2,8,128], index: 0, kind: input, shape index: {}]   ;;  %s971_s1 = inlined_call_operand.hbm [shape: f32[2,8,128], index: 1, kind: input, shape index: {}]   ;;  %s972_s2 = inlined_call_operand.hbm [shape: f32[1,2,8,128], index: 2, kind: output, shape index: {0}]   ;;  %s973_s3 = inlined_call_operand.hbm [shape: f32[1,2,8,128], index: 3, kind: output, shape index: {1}]  }
   0x1   :  { %11 = vsyncpa [#allocation3 + $0x1], 0 }
   0x2   :  { %12 = vsyncpa [#allocation6], 0 }
   0x3   :  { %14 = vsyncpa [#allocation6 + $0x1], 0 }
   0x4   :  { %15 = vsyncpa [#allocation4], 0 }
   0x5   :  { %17 = vsyncpa [#allocation4 + $0x1], 0 }
   0x6   :  { %18 = vsyncpa [#allocation9], 0 }
   0x7   :  { %20 = vsyncpa [#allocation9 + $0x1], 0  ;;  %s769_s12 = smov 0   ;;  %s771_s13 = smov 0  }
   0x8   :  { %s773_s14 = smov 0   ;;  %s775_s15 = smov 0  }
   0x9   :  { %s777_s16 = smov 0   ;;  %s779_s17 = smov 0  }
   0xa LB: > { %s481_s18 = sadd.s32 4294967295, %s743_s17   ;;  %s482_s19 = sadd.s32 4294967294, %s743_s17   ;;  %s743_s17 = sphi %s779_s17, %s26_s17   ;;  %s739_s16 = sphi %s777_s16, %s985_s16   ;;  %s735_s15 = sphi %s775_s15, %s984_s15   ;;  %s731_s14 = sphi %s773_s14, %s983_s14   ;;  %s727_s13 = sphi %s771_s13, %s982_s13   ;;  %s723_s12 = sphi %s769_s12, %s981_s12  }
   0xb   : > { %s41_s20 = sadd.s32 1, %s739_s16  ;;  %s60_s21 = sadd.s32 1, %s731_s14 }
   0xc   : > { %p43_p0 = scmp.ge.s32.totalorder %s41_s20, 2  ;;  %p67_p1 = scmp.ne.s32.totalorder %s731_s14, %s727_s13 }
   0xd   : > { %p68_p2 = scmp.eq.s32.totalorder %s743_s17, 0  ;;  %p73_p3 = scmp.ne.s32.totalorder %s727_s13, %s723_s12 }
   0xe   : > { %s987_s20 = smov (%p43_p0, %s41_s20), 0  ;;  %p74_p5 = scmp.eq.s32.totalorder %s481_s18, 0 }
   0xf   : > { %p810_p4 = por %p68_p2, %p67_p1  ;;  %s55_s23 = ssub.s32 %s739_s16, %s987_s20 }
  0x10   : > { %p133_p6 = scmp.eq.s32.totalorder %s481_s18, 1  ;;  %p58_p7 = scmp.eq.s32.totalorder %s55_s23, 0 }
  0x11   : > { %p816_p8 = por %p74_p5, %p73_p3  ;;  %p139_p10 = scmp.eq.s32.totalorder %s482_s19, 1 }
  0x12   : > { %p820_p9 = por %p133_p6, %p67_p1  ;;  %p522_p13 = scmp.lt.s32.totalorder %s743_s17, 2 }
  0x13   : > { %s825_s26 = scalar_select %p58_p7, %s731_s14, %s60_s21  }
  0x14   : > { %p827_p11 = por %p139_p10, %p73_p3  ;;  %s834_s28 = sand.u32 1, %s731_s14  }
  0x15   : > { %s485_s29 = sshll.u32 %s834_s28, 3  ;;  %s486_s30 = sshll.u32 %s739_s16, 7 }
  0x16   : > { %s200_s6 = scalar_lea.hbm %s970_s0, %s486_s30  ;;  %s191_s7 = scalar_lea.vmem [#allocation2], %s485_s29 }
  0x17   : > { %s202_s8 = sshll.u32 %s191_s7, 4  ;;  %p843_p0 = pnand %p522_p13, %p810_p4  ;;  %s203_s8 = int_to_ptr.vmem [resolvable:$true] %s202_s8 }
  0x18   : > { %p489_p1 = scmp.ge.s32.totalorder %s743_s17, 1  ;;  %p229_p2 = scmp.lt.s32.totalorder %s743_s17, 3 }
  0x19   : > { %s188_s10 = scalar_lea.sflag [#allocation3], %s834_s28  ;;  %p575_p3 = pneg %p843_p0 }
  0x1a   : > { %s586_s11 = scalar_lea.vmem %s203_s8, 128  ;;  %s745_s18 = smov [#allocation2]  }
  0x1b   : > { %p587_p5 = scmp.ne.s32.totalorder %s203_s8, %s586_s11  ;;  %s591_s19 = sshll.u32 %s745_s18, 4  ;;  %s592_s19 = int_to_ptr.vmem [resolvable:$false] %s591_s19 }
  0x1c   : > { %s593_s21 = scalar_lea.vmem %s592_s19, 256  ;;  %p594_p4 = scmp.lt.s32.totalorder %s203_s8, %s592_s19 }
  0x1d   : > { %p589_p6 = pnand %p587_p5, %p575_p3  ;;  %p595_p10 = scmp.lt.s32.totalorder %s593_s21, %s586_s11 }
  0x1f   : > { %p590_p7 = pneg %p589_p6  ;;  %p596_p13 = por %p595_p10, %p594_p4 }
  0x21   : > { %p597_p12 = pnand %p596_p13, %p590_p7 }
  0x23   : > { %600 = shalt.err (!%p597_p12)
}
  0x24   : > { %511 = dma.hbm_to_vmem [thread:$0]  (!%p843_p0), %s200_s6, 128, %s203_s8, %s188_s10  }
  0x25   : > { %p861_p5 = pnand %p489_p1, %p229_p2  ;;  %s222_s5 = scalar_lea.hbm %s971_s1, %s486_s30 }
  0x26   : > { %s213_s7 = scalar_lea.vmem [#allocation5], %s485_s29  ;;  %s210_s18 = scalar_lea.sflag [#allocation6], %s834_s28 }
  0x27   : > { %s224_s11 = sshll.u32 %s213_s7, 4  ;;  %s746_s6 = smov [#allocation5]   ;;  %s225_s11 = int_to_ptr.vmem [resolvable:$true] %s224_s11 }
  0x28   : > { %s614_s19 = scalar_lea.vmem %s225_s11, 128  ;;  %s619_s8 = sshll.u32 %s746_s6, 4  ;;  %s620_s8 = int_to_ptr.vmem [resolvable:$false] %s619_s8 }
  0x29   : > { %p615_p12 = scmp.ne.s32.totalorder %s225_s11, %s614_s19  ;;  %s621_s10 = scalar_lea.vmem %s620_s8, 256 }
  0x2a   : > { %p622_p1 = scmp.lt.s32.totalorder %s225_s11, %s620_s8  ;;  %p623_p2 = scmp.lt.s32.totalorder %s621_s10, %s614_s19 }
  0x2b   : > { %p617_p6 = pnand %p615_p12, %p575_p3 }
  0x2c   : > { %p624_p4 = por %p623_p2, %p622_p1 }
  0x2d   : > { %p618_p7 = pneg %p617_p6 }
  0x2f   : > { %p625_p10 = pnand %p624_p4, %p618_p7 }
  0x31   : > { %628 = shalt.err (!%p625_p10)
}
  0x32   : > { %514 = dma.hbm_to_vmem [thread:$0]  (!%p843_p0), %s222_s5, 128, %s225_s11, %s210_s18  }
  0x33   : > { %233 = sbr.rel (%p861_p5) target bundleno = 106 (0x6a), region = 28  ;;  %s877_s28 = sand.u32 (!%p861_p5), 1, %s727_s13  }
  0x34   : > { %s490_s29 = sshll.u32 (!%p861_p5), %s877_s28, 3  ;;  %s236_s30 = scalar_lea.sflag (!%p861_p5), [#allocation3], %s877_s28 }
  0x35   : > { %s239_s21 = scalar_lea.vmem (!%p861_p5), [#allocation2], %s490_s29 }
  0x38   : > { %706 = dma.done.wait (%p816_p8), %s236_s30, 128  }
  0x39   : > { %708 = vsyncadd (%p816_p8), %s236_s30, 4294967168  ;;  %s245_s9 = scalar_lea.sflag [#allocation6], %s877_s28  ;;  %s248_s23 = scalar_lea.vmem [#allocation5], %s490_s29 }
  0x3a   : > { %710 = dma.done.wait (%p816_p8), %s245_s9, 128  }
  0x3b   : > { %712 = vsyncadd (%p816_p8), %s245_s9, 4294967168  ;;  %s496_s22 = sshll.u32 %s735_s15, 7  ;;  %v293_v0 = vld [vmem:[%s239_s21] sm:$0xff]  ;;  %v294_v1 = vld [vmem:[%s248_s23] sm:$0xff]  ;;  %s273_s4 = scalar_lea.vmem [#allocation7], %s490_s29 }
  0x3c   : > { %s324_s5 = sshll.u32 %s273_s4, 4  ;;  %v296_v2 = vmul.f32 %v294_v1, %v293_v0  ;;  %v300_v3 = vadd.f32 %v294_v1, %v293_v0  ;;  %s280_s7 = scalar_lea.vmem [#allocation8], %s490_s29  ;;  %s896_s5 = int_to_ptr.vmem [resolvable:$true] %s324_s5 }
  0x3d   : > { %s339_s11 = sshll.u32 %s280_s7, 4  ;;  %s894_s6 = scalar_lea.hbm %s972_s2, %s496_s22  ;;  %s903_s11 = int_to_ptr.vmem [resolvable:$true] %s339_s11 }
  0x3e   : > { %s901_s15 = scalar_lea.hbm %s973_s3, %s496_s22  ;;  %298 = vst [vmem:[%s273_s4] sm:$0xff] %v296_v2  ;;  %302 = vst [vmem:[%s280_s7] sm:$0xff] %v300_v3  ;;  %s304_s10 = scalar_lea.sflag [#allocation4], %s877_s28 }
  0x3f   : > { %s629_s29 = scalar_lea.vmem %s896_s5, 128  ;;  %s747_s30 = smov [#allocation7]  }
  0x40   : > { %p630_p8 = scmp.ne.s32.totalorder %s896_s5, %s629_s29  ;;  %s633_s21 = sshll.u32 %s747_s30, 4  ;;  %s634_s21 = int_to_ptr.vmem [resolvable:$false] %s633_s21 }
  0x41   : > { %s635_s9 = scalar_lea.vmem %s634_s21, 256  ;;  %p636_p13 = scmp.lt.s32.totalorder %s896_s5, %s634_s21 }
  0x42   : > { %p631_p0 = pnand %p630_p8, %p820_p9  ;;  %p637_p5 = scmp.lt.s32.totalorder %s635_s9, %s629_s29 }
  0x44   : > { %p632_p3 = pneg %p631_p0  ;;  %p638_p12 = por %p637_p5, %p636_p13 }
  0x46   : > { %p639_p6 = pnand %p638_p12, %p632_p3 }
  0x48   : > { %642 = shalt.err (!%p639_p6)
}
  0x49   : > { %s643_s23 = scalar_lea.hbm %s894_s6, 128  ;;  %s647_s7 = scalar_lea.hbm %s972_s2, 256 }
  0x4a   : > { %p644_p7 = scmp.ne.s32.totalorder %s894_s6, %s643_s23  ;;  %p648_p4 = scmp.lt.s32.totalorder %s894_s6, %s972_s2 }
  0x4b   : > { %p649_p10 = scmp.lt.s32.totalorder %s647_s7, %s643_s23 }
  0x4c   : > { %p645_p1 = pnand %p644_p7, %p820_p9 }
  0x4d   : > { %p650_p8 = por %p649_p10, %p648_p4 }
  0x4e   : > { %p646_p2 = pneg %p645_p1 }
  0x50   : > { %p651_p0 = pnand %p650_p8, %p646_p2 }
  0x52   : > { %654 = shalt.err (!%p651_p0)
}
  0x53   : > { %504 = dma.vmem_to_hbm [thread:$0]  (%p820_p9), %s896_s5, 128, %s894_s6, %s304_s10  }
  0x54   : > { %s309_s24 = scalar_lea.sflag [#allocation9], %s877_s28  ;;  %s655_s8 = scalar_lea.vmem %s903_s11, 128 }
  0x55   : > { %p656_p3 = scmp.ne.s32.totalorder %s903_s11, %s655_s8  ;;  %s748_s29 = smov [#allocation8]  }
  0x56   : > { %s659_s30 = sshll.u32 %s748_s29, 4  ;;  %s660_s30 = int_to_ptr.vmem [resolvable:$false] %s659_s30 }
  0x57   : > { %p657_p13 = pnand %p656_p3, %p820_p9  ;;  %s661_s21 = scalar_lea.vmem %s660_s30, 256 }
  0x58   : > { %p662_p12 = scmp.lt.s32.totalorder %s903_s11, %s660_s30  ;;  %p663_p6 = scmp.lt.s32.totalorder %s661_s21, %s655_s8 }
  0x59   : > { %p658_p5 = pneg %p657_p13 }
  0x5a   : > { %p664_p7 = por %p663_p6, %p662_p12 }
  0x5c   : > { %p665_p1 = pnand %p664_p7, %p658_p5 }
  0x5e   : > { %668 = shalt.err (!%p665_p1)
}
  0x5f   : > { %s669_s5 = scalar_lea.hbm %s901_s15, 128  ;;  %s673_s10 = scalar_lea.hbm %s973_s3, 256 }
  0x60   : > { %p670_p2 = scmp.ne.s32.totalorder %s901_s15, %s669_s5  ;;  %p674_p8 = scmp.lt.s32.totalorder %s901_s15, %s973_s3 }
  0x61   : > { %p675_p0 = scmp.lt.s32.totalorder %s673_s10, %s669_s5 }
  0x62   : > { %p671_p4 = pnand %p670_p2, %p820_p9 }
  0x63   : > { %p676_p3 = por %p675_p0, %p674_p8 }
  0x64   : > { %p672_p10 = pneg %p671_p4 }
  0x66   : > { %p677_p13 = pnand %p676_p3, %p672_p10 }
  0x68   : > { %680 = shalt.err (!%p677_p13)
}
  0x69   : > { %505 = dma.vmem_to_hbm [thread:$0]  (%p820_p9), %s903_s11, 128, %s901_s15, %s309_s24  }
  0x6a PF: > { %s351_s22 = sand.u32 1, %s723_s12   ;;  %p980_p5 = scmp.ge.s32.totalorder %s743_s17, 2 }
  0x6b   : > { %s352_s4 = scalar_lea.sflag [#allocation4], %s351_s22 }
  0x6c   : > { %p516_p12 = pnand %p980_p5, %p827_p11 }
  0x6e   : > { %p517_p6 = pneg %p516_p12 }
  0x70   : > { %714 = dma.done.wait (%p517_p6), %s352_s4, 128  }
  0x71   : > { %716 = vsyncadd (%p517_p6), %s352_s4, 4294967168  ;;  %s361_s7 = scalar_lea.sflag [#allocation9], %s351_s22 }
  0x72   : > { %718 = dma.done.wait (%p517_p6), %s361_s7, 128  }
  0x73   : > { %720 = vsyncadd (%p517_p6), %s361_s7, 4294967168  ;;  %s26_s17 = sadd.s32 1, %s743_s17   ;;  %s981_s12 = smov %s727_s13 }
  0x74   : > { %p23_p7 = scmp.ge.s32.totalorder %s26_s17, 4   ;;  %s982_s13 = smov %s731_s14 }
  0x75   : > { %s983_s14 = smov %s825_s26  ;;  %s984_s15 = smov %s739_s16 }
  0x76   : > { %s985_s16 = smov %s987_s20  ;;  %25 = sbr.rel (!%p23_p7) target bundleno = 10 (0xa), region = 107 }
  0x7b   :  { %366 = vsyncpa [#allocation3], 1 }
  0x7c   :  { %368 = vsyncpa [#allocation3 + $0x1], 1 }
  0x7d   :  { %369 = vsyncpa [#allocation6], 1 }
  0x7e   :  { %371 = vsyncpa [#allocation6 + $0x1], 1 }
  0x7f   :  { %372 = vsyncpa [#allocation4], 1 }
  0x80   :  { %374 = vsyncpa [#allocation4 + $0x1], 1 }
  0x81   :  { %375 = vsyncpa [#allocation9], 1 }
  0x82   :  { %377 = vsyncpa [#allocation9 + $0x1], 1 }

</bundles_post_ra>
